<compile_context>
chip_gen: v6e
topology: v6e:2x2x1
jax: 0.10.0
libtpu: 0.0.40
codegen_flags: <defaults>
</compile_context>

<pallas_src>
import functools

import jax
import jax.numpy as jnp
from jax.experimental import pallas as pl
from jax.experimental.pallas import tpu as pltpu


def _round_up(x, m):
    return ((x + m - 1) // m) * m


# ------------------------- per-generation tile budget -------------------------
def _tpu_budget():
    """Returns (tm_max, vmem_limit_bytes).

    128 MiB-VMEM parts (v5e/v6e): allow 1024-row tiles (amortize ~0.35 us/step).
    64 MiB-VMEM v7x / unknown HW: keep the conservative 512-row cap.
    vmem_limit_bytes stays explicit (v5e's scoped default is only 16 MiB)."""
    tm_max, vmem_limit = 512, 32 * 1024 * 1024
    try:
        vmem = getattr(pltpu.get_tpu_info(), "vmem_capacity_bytes", 0) or 0
        if vmem >= 96 * 1024 * 1024:          # v5e / v6e class (128 MiB VMEM)
            tm_max = 1024
    except Exception:                          # off-TPU / interpret fallback
        pass
    return tm_max, vmem_limit


def _pick_tm(n_rows, tm_max):
    """Row-tile size: aim for >=8 grid steps so each v7x TensorCore still sees
    >=4 pipelined steps after the 'parallel' split; floor of 128 rows, always a
    multiple of 8 (sublane), capped by tm_max and by N itself."""
    tm = _round_up(max(128, pl.cdiv(n_rows, 8)), 8)
    tm = min(tm, tm_max, _round_up(n_rows, 8))
    return max(tm, 8)


# ----------------------------- Pallas kernels ---------------------------------
def _linear_kernel(x_ref, wt_ref, o_ref):
    # x_ref: (TM, in_f) row tile; wt_ref: (in_f, out_f) VMEM-resident bf16.
    # astype is a no-op when the caller already feeds bf16 activations.
    x = x_ref[...].astype(wt_ref.dtype)
    acc = jnp.dot(x, wt_ref[...], preferred_element_type=jnp.float32)
    # NOTE: block 0 of W is an exact identity, so y[:, :in_f] == x; skipping
    # that third of the MXU work is not worth it while the kernel is HBM-bound.
    o_ref[...] = acc.astype(o_ref.dtype)


def _linear_bias_kernel(x_ref, wt_ref, b_ref, o_ref):
    x = x_ref[...].astype(wt_ref.dtype)
    acc = jnp.dot(x, wt_ref[...], preferred_element_type=jnp.float32)
    o_ref[...] = (acc + b_ref[...].astype(jnp.float32)).astype(o_ref.dtype)


@functools.partial(jax.jit,
                   static_argnames=("tm", "out_dtype", "vmem_limit_bytes"))
def _pallas_linear(x, wt, bias, *, tm, out_dtype, vmem_limit_bytes):
    N, in_f = x.shape
    out_f = wt.shape[1]
    grid = (pl.cdiv(N, tm),)

    in_specs = [
        # Row tiles of x stream through the default double buffer.
        pl.BlockSpec((tm, in_f), lambda i: (i, 0)),
        # Weight: constant index_map -> fetched once and VMEM-resident; a
        # single buffer drops the redundant second copy (~0.4 MiB bf16).
        pl.BlockSpec((in_f, out_f), lambda i: (0, 0),
                     pipeline_mode=pl.Buffered(1)),
    ]
    args = [x, wt]
    kernel = _linear_kernel
    bias_bytes = 0
    if bias is not None:
        in_specs.append(pl.BlockSpec((1, out_f), lambda i: (0, 0)))
        args.append(bias)
        kernel = _linear_bias_kernel
        bias_bytes = bias.size * bias.dtype.itemsize

    cost = pl.CostEstimate(
        flops=2 * N * in_f * out_f,
        transcendentals=0,
        bytes_accessed=(x.size * x.dtype.itemsize
                        + wt.size * wt.dtype.itemsize
                        + N * out_f * jnp.dtype(out_dtype).itemsize
                        + bias_bytes),
    )

    return pl.pallas_call(
        kernel,
        out_shape=jax.ShapeDtypeStruct((N, out_f), out_dtype),
        grid=grid,
        in_specs=in_specs,
        out_specs=pl.BlockSpec((tm, out_f), lambda i: (i, 0)),
        compiler_params=pltpu.CompilerParams(
            dimension_semantics=("parallel",),   # shard row grid across TCs
            vmem_limit_bytes=vmem_limit_bytes,
        ),
        cost_estimate=cost,
    )(*args)


def pallas_linear(x, wt, bias=None, *, tm=None, out_dtype=jnp.bfloat16):
    """y = x @ wt (+ bias), wt already transposed to (in_f, out_f).

    x:    (N, in_f)  bf16 preferred (f32 accepted; cast inside the kernel)
    wt:   (in_f, out_f) bf16 (pre-transposed once at construction)
    bias: optional (1, out_f); None skips its DMA and the VPU add
    out_dtype: bf16 by default (the kernel is HBM-bound and out_f = 3*in_f so
               the writeback dominates traffic); use jnp.float32 if required.
    """
    n_rows = x.shape[0]
    tm_max, vmem_limit = _tpu_budget()
    if tm is None:
        tm = _pick_tm(n_rows, tm_max)
    else:
        tm = min(_round_up(tm, 8), _round_up(n_rows, 8))
    return _pallas_linear(x, wt, bias, tm=tm, out_dtype=out_dtype,
                          vmem_limit_bytes=vmem_limit)


# -------------------------- parameter construction ----------------------------
def make_expansion_params(key, in_features, compute_dtype=jnp.bfloat16):
    """Reproduce _init_expansion_layers: weight (out,in) = 3 stacked identities,
    blocks 1,2 get +0.1*randn; zero bias.  The weight is pre-transposed ONCE to
    (in, out) in `compute_dtype` (lane-dense output, no per-call transpose)."""
    eye = jnp.eye(in_features, dtype=jnp.float32)
    k1, k2 = jax.random.split(key)
    blocks = [
        eye,
        eye + 0.1 * jax.random.normal(k1, (in_features, in_features), jnp.float32),
        eye + 0.1 * jax.random.normal(k2, (in_features, in_features), jnp.float32),
    ]
    weight = jnp.concatenate(blocks, axis=0)              # (3*in, in) PyTorch layout
    wt = weight.T.astype(compute_dtype)                   # (in, 3*in)
    bias = jnp.zeros((1, 3 * in_features), jnp.float32)   # zero per the reference init
    bias_is_zero = bool(jnp.all(bias == 0))               # gate the skip on a real check
    return wt, bias, bias_is_zero


class FeatureExpansionWrapper:
    """JAX/Pallas port of the PyTorch FeatureExpansionWrapper."""

    def __init__(self, base_model, key, compute_dtype=jnp.bfloat16,
                 out_dtype=jnp.bfloat16):
        self.base_model = base_model
        self.out_dtype = out_dtype
        k32, k64 = jax.random.split(key)
        self.feature_expanders = {
            "32x4_to_32x12": make_expansion_params(k32, 128, compute_dtype),
            "64x4_to_64x12": make_expansion_params(k64, 256, compute_dtype),
        }

    def expand(self, name, x, *, tm=None, out_dtype=None):
        wt, bias, bias_is_zero = self.feature_expanders[name]
        out_dtype = self.out_dtype if out_dtype is None else out_dtype
        # Bias DMA/add only skipped when it is verifiably all zeros; loaded
        # (non-zero) parameters take the bias kernel path automatically.
        b = None if bias_is_zero else bias
        return pallas_linear(x, wt, b, tm=tm, out_dtype=out_dtype)

    def __call__(self, *args, **kwargs):
        # forward(): pure delegation to base_model
        return self.base_model(*args, **kwargs)


# ----------------------------------- demo -------------------------------------
if __name__ == "__main__":
    key = jax.random.PRNGKey(0)
    k_params, k_x, k_f32, k_f64 = jax.random.split(key, 4)

    wrapper = FeatureExpansionWrapper(base_model=lambda x: x, key=k_params)

    # Pass-through forward (identity base_model), NCHW-style input.
    x = jax.random.normal(k_x, (2, 4, 16, 16), jnp.float32)
    y = wrapper(x)

    # Feature-expansion hot path: bf16 activations in, bf16 out (mem-bound).
    # N=1024 -> TM=128 -> 8 grid steps (>=4 per v7x TensorCore).
    feats_32x4 = jax.random.normal(k_f32, (1024, 128), jnp.float32).astype(jnp.bfloat16)
    feats_64x4 = jax.random.normal(k_f64, (1024, 256), jnp.float32).astype(jnp.bfloat16)

    out_32x12 = wrapper.expand("32x4_to_32x12", feats_32x4)   # (1024, 384) bf16
    out_64x12 = wrapper.expand("64x4_to_64x12", feats_64x4)   # (1024, 768) bf16

    # f32-caller fallback path (in-kernel cast, f32 output) exercised once.
    out_f32_in = wrapper.expand("32x4_to_32x12", feats_32x4.astype(jnp.float32),
                                out_dtype=jnp.float32)

    jax.block_until_ready((y, out_32x12, out_64x12, out_f32_in))

    # Correctness checks.
    for name, feats, out in [
        ("32x4_to_32x12", feats_32x4, out_32x12),
        ("64x4_to_64x12", feats_64x4, out_64x12),
    ]:
        wt, bias, _ = wrapper.feature_expanders[name]
        out_f32 = out.astype(jnp.float32)
        # Reference with the same bf16 operands + f32 accumulation (tight; the
        # slack covers bf16 output rounding of the Pallas result).
        ref_bf16 = jnp.dot(feats.astype(wt.dtype), wt,
                           preferred_element_type=jnp.float32) + bias
        assert out.shape == ref_bf16.shape, (out.shape, ref_bf16.shape)
        assert jnp.max(jnp.abs(out_f32 - ref_bf16)) < 0.15, name
        # Full-f32 reference (loose bound covering bf16 weight/output rounding).
        ref_f32 = jnp.dot(feats.astype(jnp.float32), wt.astype(jnp.float32),
                          preferred_element_type=jnp.float32) + bias
        assert jnp.max(jnp.abs(out_f32 - ref_f32)) < 0.6, name

    # f32-input path agrees with the bf16-input path up to output rounding.
    assert out_f32_in.dtype == jnp.float32
    assert jnp.max(jnp.abs(out_f32_in - out_32x12.astype(jnp.float32))) < 0.15

    assert jnp.array_equal(y, x)

    print("KERNEL_OK")
</pallas_src>

<mosaic_0001>
module attributes {stable_mosaic.version = 11 : i64} {
  func.func @_linear_kernel(%arg0: i32, %arg1: memref<128x128xbf16, #tpu.memory_space<vmem>>, %arg2: memref<128x384xbf16, #tpu.memory_space<vmem>>, %arg3: memref<128x384xbf16, #tpu.memory_space<vmem>>) attributes {dimension_semantics = [#tpu.dimension_semantics<parallel>], iteration_bounds = array<i64: 8>, scalar_prefetch = 0 : i64, scratch_operands = 0 : i64, tpu.core_type = #tpu.core_type<tc>, window_params = [{transform_indices = @transform_0, window_bounds = array<i64: 128, 128>}, {pipeline_mode = #tpu.pipeline_mode<synchronous>, transform_indices = @transform_1, window_bounds = array<i64: 128, 384>}, {transform_indices = @transform_2, window_bounds = array<i64: 128, 384>}]} {
    %c0 = arith.constant 0 : index
    %c0_0 = arith.constant 0 : index
    %0 = vector.load %arg1[%c0, %c0_0] : memref<128x128xbf16, #tpu.memory_space<vmem>>, vector<128x128xbf16>
    %c0_1 = arith.constant 0 : index
    %c0_2 = arith.constant 0 : index
    %1 = vector.load %arg2[%c0_1, %c0_2] : memref<128x384xbf16, #tpu.memory_space<vmem>>, vector<128x384xbf16>
    %cst = arith.constant dense<0.000000e+00> : vector<128x384xf32>
    %2 = tpu.matmul %0, %1, %cst {dimension_numbers = #tpu.dot_dimension_numbers<[1], [0], [0], [1], [0, 0, 1, 1], [], []>} : vector<128x128xbf16>, vector<128x384xbf16>, vector<128x384xf32> -> vector<128x384xf32>
    %3 = arith.truncf %2 : vector<128x384xf32> to vector<128x384xbf16>
    %c0_3 = arith.constant 0 : index
    %c0_4 = arith.constant 0 : index
    %4 = vector.load %arg3[%c0_3, %c0_4] : memref<128x384xbf16, #tpu.memory_space<vmem>>, vector<128x384xbf16>
    tpu.vector_store %arg3[%c0_3, %c0_4], %3 {strides = array<i32>} : memref<128x384xbf16, #tpu.memory_space<vmem>>, vector<128x384xbf16>,
    return
  }
  func.func @transform_0(%arg0: i32) -> (i32, i32) {
    %c0_i32 = arith.constant 0 : i32
    %c0_i32_0 = arith.constant 0 : i32
    return %arg0, %c0_i32 : i32, i32
  }
  func.func @transform_1(%arg0: i32) -> (i32, i32) {
    %c0_i32 = arith.constant 0 : i32
    %c0_i32_0 = arith.constant 0 : i32
    %c0_i32_1 = arith.constant 0 : i32
    return %c0_i32, %c0_i32_0 : i32, i32
  }
  func.func @transform_2(%arg0: i32) -> (i32, i32) {
    %c0_i32 = arith.constant 0 : i32
    %c0_i32_0 = arith.constant 0 : i32
    return %arg0, %c0_i32 : i32, i32
  }
}

</mosaic_0001>

<bundles_post_ra>
// kernel: _pallas_linear.1
= control target key start
LH: loop header
LB: loop body
LE: loop exit
PB: predicated region body
PF: predicated region fallthrough
CT: control target
= control target key end

     0   :  { %7 = vsyncpa [#allocation3], 0  ;;  %s1548_s0 = inlined_call_operand.hbm [shape: bf16[1024,128], index: 0, kind: input, shape index: {}]   ;;  %s1549_s1 = inlined_call_operand.hbm [shape: bf16[128,384], index: 1, kind: input, shape index: {}]   ;;  %s1550_s2 = inlined_call_operand.hbm [shape: bf16[1024,384], index: 2, kind: output, shape index: {}]  }
   0x1   :  { %9 = vsyncpa [#allocation3 + $0x1], 0 }
   0x2   :  { %10 = vsyncpa [#allocation6], 0 }
   0x3   :  { %11 = vsyncpa [#allocation4], 0 }
   0x4   :  { %13 = vsyncpa [#allocation4 + $0x1], 0  ;;  %s1319_s9 = smov 0   ;;  %s1321_s10 = smov 0  }
   0x5   :  { %s1323_s11 = smov 0   ;;  %s1325_s12 = smov 0  }
   0x6 LB: > { %s1340_s13 = sadd.s32 4294967295, %s1292_s12   ;;  %s904_s14 = sadd.s32 4294967294, %s1292_s12   ;;  %s1292_s12 = sphi %s1325_s12, %s1571_s12   ;;  %s1288_s11 = sphi %s1323_s11, %s1570_s11   ;;  %s1284_s10 = sphi %s1321_s10, %s1569_s10   ;;  %s1280_s9 = sphi %s1319_s9, %s1568_s9  }
   0x7   : > { %p39_p0 = scmp.ne.s32.totalorder %s1284_s10, %s1280_s9  ;;  %p1551_p1 = scmp.eq.s32.totalorder %s1340_s13, 0 }
   0x8   : > { %p90_p3 = scmp.eq.s32.totalorder %s904_s14, 7  ;;  %p905_p5 = scmp.ge.s32.totalorder %s1292_s12, 1 }
   0x9   : > { %p1349_p4 = por %p1551_p1, %p39_p0  ;;  %p97_p7 = scmp.lt.s32.totalorder %s1292_s12, 9 }
   0xa   : > { %p1354_p6 = por %p90_p3, %p39_p0  ;;  %s1294_s18 = smov [#allocation5]  }
   0xb   : > { %s1555_s15 = scalar_select %p1349_p4, 1, 0 }
   0xc   : > { %s1556_s16 = scalar_select %p1354_p6, 1, 0 }
   0xd   : > { %p1359_p8 = pnand %p905_p5, %p97_p7  ;;  %s109_s19 = sshll.u32 %s1294_s18, 4  ;;  %s110_s19 = int_to_ptr.vmem [resolvable:$true] %s109_s19 }
   0xe   : > { %s1372_s21 = sadd.s32 1, %s1292_s12   ;;  %s26_s22 = sadd.s32 1, %s1288_s11 }
   0xf   : > { %s1557_s17 = scalar_select %p1359_p8, 1, 0 }
  0x10   : > { %p1074_p9 = pneg %p1359_p8  ;;  %s23_s23 = ssub.s32 %s1292_s12, %s1372_s21 }
  0x11   : > { %s1181_s24 = scalar_lea.vmem %s110_s19, 3072  ;;  %p1189_p3 = scmp.lt.s32.totalorder %s110_s19, %s110_s19 }
  0x12   : > { %p1367_p10 = pnand %p1074_p9, %p1551_p1  ;;  %p1182_p12 = scmp.ne.s32.totalorder %s110_s19, %s1181_s24 }
  0x13   : > { %p1190_p5 = scmp.lt.s32.totalorder %s1181_s24, %s1181_s24 }
  0x14   : > { %p1172_p11 = pneg %p1367_p10 }
  0x15   : > { %p1191_p7 = por %p1190_p5, %p1189_p3 }
  0x16   : > { %p1184_p13 = pnand %p1182_p12, %p1172_p11 }
  0x18   : > { %p1185_p0 = pneg %p1184_p13 }
  0x1a   : > { %p1192_p2 = pnand %p1191_p7, %p1185_p0 }
  0x1c   : > { %1195 = shalt.err (!%p1192_p2)
}
  0x1d   : > { %s1295_s25 = smov 192   ;;  %s1296_s26 = smov 12  }
  0x1e   : > { %1077 = dma.hbm_to_vmem [thread:$0]  (!%p1367_p10), %s1549_s1, 3072, %s110_s19, [#allocation6], %s1295_s25, %s1295_s25, %s1296_s26  }
  0x1f   : > { %p24_p9 = scmp.eq.s32.totalorder %s23_s23, 0  ;;  %p33_p11 = scmp.ne.s32.totalorder %s1288_s11, %s1284_s10 }
  0x20   : > { %p34_p12 = scmp.eq.s32.totalorder %s1292_s12, 0  ;;  %p1087_p2 = scmp.lt.s32.totalorder %s1292_s12, 8 }
  0x21   : > { %s1389_s29 = scalar_select %p24_p9, %s1288_s11, %s26_s22  }
  0x22   : > { %p35_p13 = por %p34_p12, %p33_p11  ;;  %p1559_p0 = scmp.eq.s32.totalorder %s1340_s13, 7 }
  0x23   : > { %s123_s3 = sand.u32 1, %s1288_s11   ;;  %s983_s4 = sshll.u32 %s1292_s12, 10 }
  0x24   : > { %p1393_p3 = por %p1559_p0, %p33_p11  ;;  %s908_s5 = sshll.u32 %s123_s3, 6 }
  0x25   : > { %s1402_s8 = scalar_lea.hbm %s1548_s0, %s983_s4  ;;  %s127_s14 = scalar_lea.vmem [#allocation2], %s908_s5 }
  0x26   : > { %s1560_s30 = scalar_select %p1393_p3, 1, 0 }
  0x27   : > { %s134_s18 = sshll.u32 %s127_s14, 4  ;;  %p1404_p10 = pnand %p1087_p2, %p35_p13  ;;  %s1408_s18 = int_to_ptr.vmem [resolvable:$true] %s134_s18 }
  0x28   : > { %s1410_s20 = scalar_lea.sflag [#allocation3], %s123_s3  ;;  %s1196_s22 = scalar_lea.hbm %s1402_s8, 1024 }
  0x29   : > { %p1197_p5 = scmp.ne.s32.totalorder %s1402_s8, %s1196_s22  ;;  %p1198_p7 = pneg %p1404_p10 }
  0x2a   : > { %s1201_s25 = scalar_lea.hbm %s1548_s0, 8192  ;;  %p1202_p12 = scmp.lt.s32.totalorder %s1402_s8, %s1548_s0 }
  0x2b   : > { %p1199_p9 = pnand %p1198_p7, %p1197_p5  ;;  %p1203_p2 = scmp.lt.s32.totalorder %s1201_s25, %s1196_s22 }
  0x2d   : > { %p1200_p11 = pneg %p1199_p9  ;;  %p1204_p13 = por %p1203_p2, %p1202_p12 }
  0x2f   : > { %p1205_p0 = pnand %p1204_p13, %p1200_p11 }
  0x31   : > { %1208 = shalt.err (!%p1205_p0)
}
  0x32   : > { %s1209_s28 = scalar_lea.vmem %s1408_s18, 1024  ;;  %s1297_s3 = smov [#allocation2]  }
  0x33   : > { %p1210_p1 = scmp.ne.s32.totalorder %s1408_s18, %s1209_s28  ;;  %s1214_s4 = sshll.u32 %s1297_s3, 4  ;;  %s1215_s4 = int_to_ptr.vmem [resolvable:$false] %s1214_s4 }
  0x34   : > { %s1216_s5 = scalar_lea.vmem %s1215_s4, 2048  ;;  %p1217_p9 = scmp.lt.s32.totalorder %s1408_s18, %s1215_s4 }
  0x35   : > { %p1212_p6 = pnand %p1210_p1, %p1198_p7  ;;  %p1218_p3 = scmp.lt.s32.totalorder %s1216_s5, %s1209_s28 }
  0x37   : > { %p1213_p5 = pneg %p1212_p6  ;;  %p1219_p4 = por %p1218_p3, %p1217_p9 }
  0x39   : > { %p1220_p8 = pnand %p1219_p4, %p1213_p5 }
  0x3b   : > { %1223 = shalt.err (!%p1220_p8)
}
  0x3c   : > { %s1298_s6 = smov 64   ;;  %s1299_s7 = smov 4  }
  0x3d   : > { %1081 = dma.hbm_to_vmem [thread:$0]  (!%p1404_p10), %s1402_s8, 1024, %s1408_s18, %s1410_s20, %s1298_s6, %s1298_s6, %s1299_s7  }
  0x3e   : > { %p1562_p1 = scmp.ne.s32.totalorder %s1557_s17, 0 }
  0x3f   : > { %s1434_s14 = sand.u32 (!%p1562_p1), 1, %s1284_s10   ;;  %p1563_p4 = scmp.ne.s32.totalorder (!%p1562_p1), %s1555_s15, 0 }
  0x40   : > { %146 = sbr.rel (%p1562_p1) target bundleno = 377 (0x179), region = 28  ;;  %s912_s22 = sshll.u32 (!%p1562_p1), %s1434_s14, 6 }
  0x41   : > { %s149_s23 = scalar_lea.sflag (!%p1562_p1), [#allocation3], %s1434_s14  ;;  %s1438_s24 = scalar_lea.vmem (!%p1562_p1), [#allocation2], %s912_s22 }
  0x45   : > { %1267 = dma.done.wait (%p1563_p4), %s149_s23, 1024  }
  0x46   : > { %1269 = vsyncadd (%p1563_p4), %s149_s23, 4294966272  ;;  %p1564_p6 = scmp.eq.s32.totalorder %s1340_s13, 0 }
  0x48   : > { %1271 = dma.done.wait (%p1564_p6), [#allocation6], 3072   ;;  %p1565_p8 = pmov %p1564_p6 }
  0x49   : > { %v1300_v0 = vmov 0   ;;  %v1130_v1 = vld [vmem:[#allocation5 + $0xac] ss:$12 sps:$4 sm:$0xff]   ;;  %v1132_v2 = vld [vmem:[#allocation5 + $0xa8] ss:$12 sps:$4 sm:$0xff]   ;;  %v1156_v12 = vld [vmem:[%s1438_s24] sm:$0xff]  }
  0x4a   : > { %1273 = vsyncadd (%p1565_p8), [#allocation6], 4294964224  ;;  %436 = vmatprep.mubr.bf16.mxu0 %v1300_v0  ;;  %404 = vmatprep.subr.bf16.mxu0 %v1130_v1  ;;  %v1133_v3 = vld [vmem:[#allocation5 + $0x94] ss:$12 sps:$4 sm:$0xff]   ;;  %v1135_v4 = vld [vmem:[#allocation5 + $0x90] ss:$12 sps:$4 sm:$0xff]  }
  0x4b   : > { %405 = vmatpush1.bf16.msra.mxu0 %v1132_v2  ;;  %v1136_v5 = vld [vmem:[#allocation5 + $0x7c] ss:$12 sps:$4 sm:$0xff]   ;;  %v1138_v6 = vld [vmem:[#allocation5 + $0x78] ss:$12 sps:$4 sm:$0xff]   ;;  %v1141_v9 = vld [vmem:[#allocation5 + $0x60] ss:$12 sps:$4 sm:$0xff]   ;;  %1048 = vmatprep.mubr.bf16.mxu1 %v1156_v12 }
  0x4c   : > { %406 = vmatprep.subr.bf16.mxu0 %v1133_v3  ;;  %v1139_v7 = vld [vmem:[#allocation5 + $0x64] ss:$12 sps:$4 sm:$0xff]   ;;  %v1142_v10 = vld [vmem:[#allocation5 + $0x4c] ss:$12 sps:$4 sm:$0xff]   ;;  %v1144_v14 = vld [vmem:[#allocation5 + $0x48] ss:$12 sps:$4 sm:$0xff]  }
  0x4d   : > { %v1151_v8 = vld [vmem:[#allocation5 + $0xb0] ss:$12 sps:$4 sm:$0xff]   ;;  %v1155_v11 = vld [vmem:[#allocation5 + $0x98] ss:$12 sps:$4 sm:$0xff]   ;;  %v1157_v13 = vld [vmem:[#allocation5 + $0x80] ss:$12 sps:$4 sm:$0xff]  }
  0x4e   : > { %1032 = vmatprep.subr.bf16.mxu1 %v1151_v8  ;;  %v1145_v15 = vld [vmem:[#allocation5 + $0x34] ss:$12 sps:$4 sm:$0xff]   ;;  %v1147_v17 = vld [vmem:[#allocation5 + $0x30] ss:$12 sps:$4 sm:$0xff]   ;;  %v1150_v20 = vld [vmem:[#allocation5 + $0x18] ss:$12 sps:$4 sm:$0xff]  }
  0x4f   : > { %407 = vmatpush1.bf16.msra.mxu0 %v1135_v4  ;;  %1033 = vmatpush3.bf16.msra.mxu1 %v1151_v8  ;;  %v1158_v16 = vld [vmem:[#allocation5 + $0x68] ss:$12 sps:$4 sm:$0xff]   ;;  %v1160_v19 = vld [vmem:[#allocation5 + $0x50] ss:$12 sps:$4 sm:$0xff]   ;;  %v1161_v22 = vld [vmem:[#allocation5 + $0x38] ss:$12 sps:$4 sm:$0xff]  }
  0x50   : > { %408 = vmatprep.subr.bf16.mxu0 %v1136_v5  ;;  %1034 = vmatprep.subr.bf16.mxu1 %v1155_v11  ;;  %v1148_v18 = vld [vmem:[#allocation5 + $0x1c] ss:$12 sps:$4 sm:$0xff]   ;;  %v1152_v21 = vld [vmem:[#allocation5 + $0x4] ss:$12 sps:$4 sm:$0xff]   ;;  %v1154_v23 = vld [vmem:[#allocation5] ss:$12 sps:$4 sm:$0xff]  }
  0x51   : > { %v1163_v24 = vld [vmem:[#allocation5 + $0x20] ss:$12 sps:$4 sm:$0xff]   ;;  %v1164_v25 = vld [vmem:[#allocation5 + $0x8] ss:$12 sps:$4 sm:$0xff]   ;;  %v1165_v28 = vld [vmem:[%s1438_s24 + $0x18] sm:$0xff]   ;;  %s1064_s15 = smul.u32 192, %s1434_s14 }
  0x52   : > { %v1159_v26 = vld [vmem:[%s1438_s24 + $0x8] sm:$0xff]   ;;  %v1162_v27 = vld [vmem:[%s1438_s24 + $0x10] sm:$0xff]   ;;  %v1166_v29 = vld [vmem:[%s1438_s24 + $0x20] sm:$0xff]   ;;  %s1065_s8 = smul.u32 3072, %s1340_s13  ;;  %s807_s26 = scalar_lea.sflag [#allocation4], %s1434_s14 }
  0x53   : > { %409 = vmatpush1.bf16.msra.mxu0 %v1138_v6  ;;  %1035 = vmatpush3.bf16.msra.mxu1 %v1155_v11  ;;  %v1168_v30 = vld [vmem:[%s1438_s24 + $0x30] sm:$0xff]   ;;  %v1167_v31 = vld [vmem:[%s1438_s24 + $0x28] sm:$0xff]   ;;  %v1169_v32 = vld [vmem:[%s1438_s24 + $0x38] sm:$0xff]   ;;  %s1465_s17 = scalar_lea.vmem [#allocation7], %s1064_s15  ;;  %p1566_p10 = scmp.ne.s32.totalorder %s1560_s30, 0 }
  0x54   : > { %410 = vmatprep.subr.bf16.mxu0 %v1139_v7  ;;  %1036 = vmatprep.subr.bf16.mxu1 %v1157_v13  ;;  %s821_s18 = sshll.u32 %s1465_s17, 4  ;;  %s1503_s25 = scalar_lea.hbm %s1550_s2, %s1065_s8  ;;  %s1505_s18 = int_to_ptr.vmem [resolvable:$true] %s821_s18 }
  0x55   : > { %s1224_s27 = scalar_lea.vmem %s1505_s18, 3072  ;;  %s1301_s13 = smov [#allocation7]  }
  0x56   : > { %p1225_p3 = scmp.ne.s32.totalorder %s1505_s18, %s1224_s27  ;;  %s1228_s28 = sshll.u32 %s1301_s13, 4  ;;  %s1229_s28 = int_to_ptr.vmem [resolvable:$false] %s1228_s28 }
  0x57   : > { %411 = vmatpush1.bf16.msra.mxu0 %v1141_v9  ;;  %1037 = vmatpush3.bf16.msra.mxu1 %v1157_v13  ;;  %s1230_s3 = scalar_lea.vmem %s1229_s28, 6144  ;;  %p1231_p12 = scmp.lt.s32.totalorder %s1505_s18, %s1229_s28 }
  0x58   : > { %412 = vmatprep.subr.bf16.mxu0 %v1142_v10  ;;  %1038 = vmatprep.subr.bf16.mxu1 %v1158_v16  ;;  %p1226_p7 = pnand %p1225_p3, %p1566_p10  ;;  %p1232_p2 = scmp.lt.s32.totalorder %s1230_s3, %s1224_s27 }
  0x5a   : > { %p1227_p11 = pneg %p1226_p7  ;;  %p1233_p13 = por %p1232_p2, %p1231_p12 }
  0x5b   : > { %413 = vmatpush1.bf16.msra.mxu0 %v1144_v14  ;;  %1039 = vmatpush3.bf16.msra.mxu1 %v1158_v16 }
  0x5c   : > { %414 = vmatprep.subr.bf16.mxu0 %v1145_v15  ;;  %1040 = vmatprep.subr.bf16.mxu1 %v1160_v19  ;;  %p1234_p0 = pnand %p1233_p13, %p1227_p11 }
  0x5f   : > { %415 = vmatpush1.bf16.msra.mxu0 %v1147_v17  ;;  %1041 = vmatpush3.bf16.msra.mxu1 %v1160_v19 }
  0x60   : > { %416 = vmatprep.subr.bf16.mxu0 %v1148_v18  ;;  %1042 = vmatprep.subr.bf16.mxu1 %v1161_v22 }
  0x63   : > { %417 = vmatpush1.bf16.msra.mxu0 %v1150_v20  ;;  %1043 = vmatpush3.bf16.msra.mxu1 %v1161_v22 }
  0x64   : > { %418 = vmatprep.subr.bf16.mxu0 %v1152_v21  ;;  %1044 = vmatprep.subr.bf16.mxu1 %v1163_v24 }
  0x67   : > { %419 = vmatpush1.bf16.msra.mxu0 %v1154_v23  ;;  %1045 = vmatpush3.bf16.msra.mxu1 %v1163_v24 }
  0x68   : > { %1046 = vmatprep.subr.bf16.mxu1 %v1164_v25 }
  0x6a   : > { %437 = vmatmul.mubr.bf16.vlgmr.msra.gmra.mxu0 %v1156_v12 }
  0x6b   : > { %446 = vmatprep.mubr.bf16.mxu0 %v1300_v0  ;;  %1047 = vmatpush3.bf16.msra.mxu1 %v1164_v25 }
  0x6e   : > { %1049 = vmatmul.mubr.bf16.vlgmr.msra.gmra.mxu1 %v1159_v26 }
  0x6f   : > { %1052 = vmatprep.mubr.bf16.mxu1 %v1162_v27 }
  0x72   : > { %447 = vmatmul.mubr.bf16.gmra.mxu0 %v1159_v26 }
  0x73   : > { %456 = vmatprep.mubr.bf16.mxu0 %v1300_v0 }
  0x76   : > { %1053 = vmatmul.mubr.bf16.gmra.mxu1 %v1165_v28 }
  0x77   : > { %1056 = vmatprep.mubr.bf16.mxu1 %v1166_v29 }
  0x7a   : > { %457 = vmatmul.mubr.bf16.gmra.mxu0 %v1162_v27 }
  0x7b   : > { %466 = vmatprep.mubr.bf16.mxu0 %v1300_v0 }
  0x7e   : > { %1057 = vmatmul.mubr.bf16.gmra.mxu1 %v1167_v31 }
  0x7f   : > { %1060 = vmatprep.mubr.bf16.mxu1 %v1168_v30 }
  0x82   : > { %467 = vmatmul.mubr.bf16.gmra.mxu0 %v1165_v28 }
  0x83   : > { %476 = vmatprep.mubr.bf16.mxu0 %v1300_v0 }
  0x86   : > { %1061 = vmatmul.mubr.bf16.gmra.mxu1 %v1169_v32 }
  0x8a   : > { %477 = vmatmul.mubr.bf16.gmra.mxu0 %v1166_v29 }
  0x8b   : > { %486 = vmatprep.mubr.bf16.mxu0 %v1300_v0 }
  0x92   : > { %487 = vmatmul.mubr.bf16.gmra.mxu0 %v1167_v31 }
  0x93   : > { %496 = vmatprep.mubr.bf16.mxu0 %v1300_v0 }
  0x9a   : > { %497 = vmatmul.mubr.bf16.gmra.mxu0 %v1168_v30 }
  0x9b   : > { %506 = vmatprep.mubr.bf16.mxu0 %v1300_v0 }
  0xa2   : > { %507 = vmatmul.mubr.bf16.gmra.mxu0 %v1169_v32 }
 0x12a   : > { %v438_v33 = vpop.f32.mrf.mxu0 }
 0x12c   : > { %v440_v34 = vpop.f32.mrf.mxu0 }
 0x12d   : > { %v984_v35 = vpack.c.bf16 %v440_v34, %v438_v33 }
 0x12e   : > { %v442_v36 = vpop.f32.mrf.mxu0  ;;  %v1050_v41 = vpop.f32.mrf.mxu1 }
 0x12f   : > { %774 = vst [vmem:[%s1465_s17] sm:$0xff] %v984_v35  ;;  %v989_v43 = vpack.c.bf16 %v1050_v41, %v1050_v41 }
 0x130   : > { %v444_v37 = vpop.f32.mrf.mxu0  ;;  %v551_v45 = vpop.f32.mrf.mxu1 }
 0x131   : > { %v986_v38 = vpack.c.bf16 %v444_v37, %v442_v36  ;;  %779 = vst [vmem:[%s1465_s17 + $0x20] sm:$0xf] %v989_v43  ;;  %v985_v46 = vpack.c.bf16 %v551_v45, %v551_v45 }
 0x132   : > { %v448_v39 = vpop.f32.mrf.mxu0  ;;  %v1051_v48 = vpop.f32.mrf.mxu1 }
 0x133   : > { %776 = vst [vmem:[%s1465_s17 + $0xc] sm:$0xff] %v986_v38  ;;  %775 = vst [vmem:[%s1465_s17 + $0x8] sm:$0xf] %v985_v46  ;;  %v991_v50 = vpack.c.bf16 %v1051_v48, %v1051_v48 }
 0x134   : > { %v450_v40 = vpop.f32.mrf.mxu0  ;;  %v554_v52 = vpop.f32.mrf.mxu1 }
 0x135   : > { %v988_v42 = vpack.c.bf16 %v450_v40, %v448_v39  ;;  %781 = vst [vmem:[%s1465_s17 + $0x2c] sm:$0xf] %v991_v50  ;;  %v987_v53 = vpack.c.bf16 %v554_v52, %v554_v52 }
 0x136   : > { %v452_v44 = vpop.f32.mrf.mxu0  ;;  %v1054_v55 = vpop.f32.mrf.mxu1 }
 0x137   : > { %778 = vst [vmem:[%s1465_s17 + $0x18] sm:$0xff] %v988_v42  ;;  %777 = vst [vmem:[%s1465_s17 + $0x14] sm:$0xf] %v987_v53  ;;  %v997_v57 = vpack.c.bf16 %v1054_v55, %v1054_v55 }
 0x138   : > { %v454_v47 = vpop.f32.mrf.mxu0  ;;  %v567_v59 = vpop.f32.mrf.mxu1 }
 0x139   : > { %v990_v49 = vpack.c.bf16 %v454_v47, %v452_v44  ;;  %787 = vst [vmem:[%s1465_s17 + $0x50] sm:$0xf] %v997_v57  ;;  %v993_v60 = vpack.c.bf16 %v567_v59, %v567_v59 }
 0x13a   : > { %v458_v51 = vpop.f32.mrf.mxu0  ;;  %v1055_v62 = vpop.f32.mrf.mxu1 }
 0x13b   : > { %780 = vst [vmem:[%s1465_s17 + $0x24] sm:$0xff] %v990_v49  ;;  %783 = vst [vmem:[%s1465_s17 + $0x38] sm:$0xf] %v993_v60  ;;  %v999_v0 = vpack.c.bf16 %v1055_v62, %v1055_v62 }
 0x13c   : > { %v460_v54 = vpop.f32.mrf.mxu0  ;;  %v570_v2 = vpop.f32.mrf.mxu1 }
 0x13d   : > { %v992_v56 = vpack.c.bf16 %v460_v54, %v458_v51  ;;  %789 = vst [vmem:[%s1465_s17 + $0x5c] sm:$0xf] %v999_v0  ;;  %v995_v3 = vpack.c.bf16 %v570_v2, %v570_v2 }
 0x13e   : > { %v462_v58 = vpop.f32.mrf.mxu0  ;;  %v1058_v5 = vpop.f32.mrf.mxu1 }
 0x13f   : > { %782 = vst [vmem:[%s1465_s17 + $0x30] sm:$0xff] %v992_v56  ;;  %785 = vst [vmem:[%s1465_s17 + $0x44] sm:$0xf] %v995_v3  ;;  %v1005_v7 = vpack.c.bf16 %v1058_v5, %v1058_v5 }
 0x140   : > { %v464_v61 = vpop.f32.mrf.mxu0  ;;  %v583_v9 = vpop.f32.mrf.mxu1 }
 0x141   : > { %v994_v63 = vpack.c.bf16 %v464_v61, %v462_v58  ;;  %795 = vst [vmem:[%s1465_s17 + $0x80] sm:$0xf] %v1005_v7  ;;  %v1001_v10 = vpack.c.bf16 %v583_v9, %v583_v9 }
 0x142   : > { %v468_v1 = vpop.f32.mrf.mxu0  ;;  %v1059_v12 = vpop.f32.mrf.mxu1 }
 0x143   : > { %784 = vst [vmem:[%s1465_s17 + $0x3c] sm:$0xff] %v994_v63  ;;  %791 = vst [vmem:[%s1465_s17 + $0x68] sm:$0xf] %v1001_v10  ;;  %v1007_v14 = vpack.c.bf16 %v1059_v12, %v1059_v12 }
 0x144   : > { %v470_v4 = vpop.f32.mrf.mxu0  ;;  %v586_v16 = vpop.f32.mrf.mxu1 }
 0x145   : > { %v996_v6 = vpack.c.bf16 %v470_v4, %v468_v1  ;;  %797 = vst [vmem:[%s1465_s17 + $0x8c] sm:$0xf] %v1007_v14  ;;  %v1003_v17 = vpack.c.bf16 %v586_v16, %v586_v16 }
 0x146   : > { %v472_v8 = vpop.f32.mrf.mxu0  ;;  %v1062_v19 = vpop.f32.mrf.mxu1 }
 0x147   : > { %786 = vst [vmem:[%s1465_s17 + $0x48] sm:$0xff] %v996_v6  ;;  %793 = vst [vmem:[%s1465_s17 + $0x74] sm:$0xf] %v1003_v17  ;;  %v1013_v21 = vpack.c.bf16 %v1062_v19, %v1062_v19 }
 0x148   : > { %v474_v11 = vpop.f32.mrf.mxu0  ;;  %v599_v23 = vpop.f32.mrf.mxu1 }
 0x149   : > { %v998_v13 = vpack.c.bf16 %v474_v11, %v472_v8  ;;  %803 = vst [vmem:[%s1465_s17 + $0xb0] sm:$0xf] %v1013_v21  ;;  %v1009_v24 = vpack.c.bf16 %v599_v23, %v599_v23 }
 0x14a   : > { %v478_v15 = vpop.f32.mrf.mxu0  ;;  %v1063_v26 = vpop.f32.mrf.mxu1 }
 0x14b   : > { %788 = vst [vmem:[%s1465_s17 + $0x54] sm:$0xff] %v998_v13  ;;  %799 = vst [vmem:[%s1465_s17 + $0x98] sm:$0xf] %v1009_v24  ;;  %v1015_v28 = vpack.c.bf16 %v1063_v26, %v1063_v26 }
 0x14c   : > { %v480_v18 = vpop.f32.mrf.mxu0  ;;  %v602_v30 = vpop.f32.mrf.mxu1 }
 0x14d   : > { %v1000_v20 = vpack.c.bf16 %v480_v18, %v478_v15  ;;  %805 = vst [vmem:[%s1465_s17 + $0xbc] sm:$0xf] %v1015_v28  ;;  %v1011_v31 = vpack.c.bf16 %v602_v30, %v602_v30 }
 0x14e   : > { %v482_v22 = vpop.f32.mrf.mxu0 }
 0x14f   : > { %790 = vst [vmem:[%s1465_s17 + $0x60] sm:$0xff] %v1000_v20  ;;  %801 = vst [vmem:[%s1465_s17 + $0xa4] sm:$0xf] %v1011_v31 }
 0x150   : > { %v484_v25 = vpop.f32.mrf.mxu0 }
 0x151   : > { %v1002_v27 = vpack.c.bf16 %v484_v25, %v482_v22 }
 0x152   : > { %v488_v29 = vpop.f32.mrf.mxu0 }
 0x153   : > { %792 = vst [vmem:[%s1465_s17 + $0x6c] sm:$0xff] %v1002_v27 }
 0x154   : > { %v490_v32 = vpop.f32.mrf.mxu0 }
 0x155   : > { %v1004_v33 = vpack.c.bf16 %v490_v32, %v488_v29 }
 0x156   : > { %v492_v34 = vpop.f32.mrf.mxu0 }
 0x157   : > { %794 = vst [vmem:[%s1465_s17 + $0x78] sm:$0xff] %v1004_v33 }
 0x158   : > { %v494_v35 = vpop.f32.mrf.mxu0 }
 0x159   : > { %v1006_v36 = vpack.c.bf16 %v494_v35, %v492_v34 }
 0x15a   : > { %v498_v37 = vpop.f32.mrf.mxu0 }
 0x15b   : > { %796 = vst [vmem:[%s1465_s17 + $0x84] sm:$0xff] %v1006_v36 }
 0x15c   : > { %v500_v38 = vpop.f32.mrf.mxu0 }
 0x15d   : > { %v1008_v39 = vpack.c.bf16 %v500_v38, %v498_v37 }
 0x15e   : > { %v502_v40 = vpop.f32.mrf.mxu0 }
 0x15f   : > { %798 = vst [vmem:[%s1465_s17 + $0x90] sm:$0xff] %v1008_v39 }
 0x160   : > { %v504_v41 = vpop.f32.mrf.mxu0 }
 0x161   : > { %v1010_v42 = vpack.c.bf16 %v504_v41, %v502_v40 }
 0x162   : > { %v508_v43 = vpop.f32.mrf.mxu0 }
 0x163   : > { %800 = vst [vmem:[%s1465_s17 + $0x9c] sm:$0xff] %v1010_v42 }
 0x164   : > { %v510_v44 = vpop.f32.mrf.mxu0 }
 0x165   : > { %v1012_v45 = vpack.c.bf16 %v510_v44, %v508_v43 }
 0x166   : > { %v512_v46 = vpop.f32.mrf.mxu0 }
 0x167   : > { %802 = vst [vmem:[%s1465_s17 + $0xa8] sm:$0xff] %v1012_v45 }
 0x168   : > { %v514_v47 = vpop.f32.mrf.mxu0 }
 0x169   : > { %v1014_v48 = vpack.c.bf16 %v514_v47, %v512_v46 }
 0x16b   : > { %804 = vst [vmem:[%s1465_s17 + $0xb4] sm:$0xff] %v1014_v48 }
 0x16c   : > { %1237 = shalt.err (!%p1234_p0)
}
 0x16d   : > { %s1238_s4 = scalar_lea.hbm %s1503_s25, 3072  ;;  %s1242_s7 = scalar_lea.hbm %s1550_s2, 24576 }
 0x16e   : > { %p1239_p5 = scmp.ne.s32.totalorder %s1503_s25, %s1238_s4  ;;  %p1243_p4 = scmp.lt.s32.totalorder %s1503_s25, %s1550_s2 }
 0x16f   : > { %p1244_p6 = scmp.lt.s32.totalorder %s1242_s7, %s1238_s4 }
 0x170   : > { %p1240_p9 = pnand %p1239_p5, %p1566_p10 }
 0x171   : > { %p1245_p8 = por %p1244_p6, %p1243_p4 }
 0x172   : > { %p1241_p1 = pneg %p1240_p9 }
 0x174   : > { %p1246_p3 = pnand %p1245_p8, %p1241_p1 }
 0x176   : > { %1249 = shalt.err (!%p1246_p3)
}
 0x177   : > { %s1302_s24 = smov 192   ;;  %s1303_s15 = smov 12  }
 0x178   : > { %1072 = dma.vmem_to_hbm [thread:$0]  (%p1566_p10), %s1505_s18, 3072, %s1503_s25, %s807_s26, %s1302_s24, %s1302_s24, %s1303_s15  }
 0x179 PF: > { %p1089_p7 = scmp.ge.s32.totalorder %s1292_s12, 2  ;;  %s836_s17 = sand.u32 1, %s1280_s9  }
 0x17a   : > { %p1567_p11 = scmp.ne.s32.totalorder %s1556_s16, 0  ;;  %s837_s8 = scalar_lea.sflag [#allocation4], %s836_s17 }
 0x17c   : > { %p1083_p12 = pnand %p1089_p7, %p1567_p11 }
 0x17e   : > { %p1084_p2 = pneg %p1083_p12 }
 0x180   : > { %1275 = dma.done.wait (%p1084_p2), %s837_s8, 3072  }
 0x181   : > { %1277 = vsyncadd (%p1084_p2), %s837_s8, 4294964224  ;;  %p16_p13 = scmp.ge.s32.totalorder %s1372_s21, 10   ;;  %s1568_s9 = smov %s1284_s10 }
 0x182   : > { %s1569_s10 = smov %s1288_s11  ;;  %s1570_s11 = smov %s1389_s29 }
 0x183   : > { %s1571_s12 = smov %s1372_s21  ;;  %18 = sbr.rel (!%p16_p13) target bundleno = 6 (0x6), region = 77 }
 0x188   :  { %842 = vsyncpa [#allocation3], 1 }
 0x189   :  { %844 = vsyncpa [#allocation3 + $0x1], 1 }
 0x18a   :  { %845 = vsyncpa [#allocation6], 1 }
 0x18b   :  { %846 = vsyncpa [#allocation4], 1 }
 0x18c   :  { %848 = vsyncpa [#allocation4 + $0x1], 1 }

</bundles_post_ra>
